<compile_context>
chip_gen: v7x
topology: tpu7x:2x2x1
jax: 0.10.0
libtpu: 0.0.40
codegen_flags: <defaults>
</compile_context>

<pallas_src>
import numpy as np
import jax
import jax.numpy as jnp
from jax import lax
from jax.experimental import pallas as pl
from jax.experimental.pallas import tpu as pltpu

# Fixed problem dimensions (from Encoder: Conv2d(2,16,3,p=1) / Conv2d(16,32,3,p=1)).
B = 2
H = W = 16
CIN = 2
C1 = 16
C2 = 32
H1, W1 = H // 2, W // 2      # after first 2x2 pool  (8, 8)
H2, W2 = H1 // 2, W1 // 2    # after second 2x2 pool (4, 4)

K1 = 3 * W * CIN             # 96   merged-K of stage-1 matmul
N1 = W * C1                  # 256  stage-1 output lanes (even-w | odd-w halves)
K2 = 3 * W1 * C1             # 384  merged-K of stage-2 matmul
N2 = W1 * C2                 # 256  stage-2 output lanes (even-w | odd-w halves)
L1 = N1 // 2                 # 128  pooled stage-1 lanes (= W1*C1)
L2 = N2 // 2                 # 128  pooled stage-2 lanes (= W2*C2)


def _stage1_row_perm():
    """Kernel-row r -> original row b*H + h.

    Row order: [even h | odd h] (stage-1 H-pool = max of row halves), and inside
    each half [even h1 | odd h1] (so the pooled rows are already ordered for the
    stage-2 H-pool), batch-major inside each quarter."""
    perm = np.zeros(B * H, np.int32)
    for b in range(B):
        for h in range(H):
            p1 = h & 1           # odd/even h        -> stage-1 H-pool half
            p2 = (h >> 1) & 1    # odd/even h1=h//2  -> stage-2 H-pool half
            j = h >> 2
            perm[(B * H // 2) * p1 + (B * H // 4) * p2 + (H // 4) * b + j] = b * H + h
    return perm


_ROW_PERM1 = _stage1_row_perm()


def _encoder_kernel(x_ref, w1_ref, s1_ref, b1_ref, w2_ref, s2_ref, b2_ref,
                    o_ref, lhs2_ref):
    # ---------------- stage 1: ONE matmul (M=32, K=96, N=256) + BN + ReLU -----
    y1 = jnp.dot(x_ref[...], w1_ref[...], preferred_element_type=jnp.float32)
    y1 = jnp.maximum(y1 * s1_ref[...] + b1_ref[...], 0.0)            # (32, 256)

    # ---------------- stage 1: 2x2 max pool (no scratch, no strided reads) ----
    y1p = jnp.maximum(y1[:, :L1], y1[:, L1:])        # W-pool: even-w | odd-w lanes
    yp1 = jnp.maximum(y1p[:16], y1p[16:])            # H-pool: even-h | odd-h rows
    ye, yo = yp1[:8], yp1[8:]                        # even-h1 rows / odd-h1 rows

    # ---------------- stage 2 LHS staging: lanes = [dh=0 | dh=1 | dh=2] -------
    # Output rows 0..7 = even-h1 positions, rows 8..15 = odd-h1 positions.
    # All stores are full-128-lane aligned; only the 4 halo rows are zeroed.
    z1 = jnp.zeros((1, L1), jnp.float32)
    # identity slots
    lhs2_ref[0:8, L1:2 * L1] = ye                    # dh=1 of even rows (h1)
    lhs2_ref[0:8, 2 * L1:3 * L1] = yo                # dh=2 of even rows (h1+1, odd)
    lhs2_ref[8:16, 0:L1] = ye                        # dh=0 of odd rows  (h1-1, even)
    lhs2_ref[8:16, L1:2 * L1] = yo                   # dh=1 of odd rows  (h1)
    # dh=0 of even rows: pooled row h1-1 (odd), shifted by one row, zero at h1==0
    lhs2_ref[0:1, 0:L1] = z1
    lhs2_ref[1:4, 0:L1] = yo[0:3]
    lhs2_ref[4:5, 0:L1] = z1
    lhs2_ref[5:8, 0:L1] = yo[4:7]
    # dh=2 of odd rows: pooled row h1+1 (even), shifted by one row, zero at h1==7
    lhs2_ref[8:11, 2 * L1:3 * L1] = ye[1:4]
    lhs2_ref[11:12, 2 * L1:3 * L1] = z1
    lhs2_ref[12:15, 2 * L1:3 * L1] = ye[5:8]
    lhs2_ref[15:16, 2 * L1:3 * L1] = z1

    # ---------------- stage 2: ONE matmul (M=16, K=384, N=256) + BN + ReLU ----
    y2 = jnp.dot(lhs2_ref[...].astype(jnp.bfloat16), w2_ref[...],
                 preferred_element_type=jnp.float32)
    y2 = jnp.maximum(y2 * s2_ref[...] + b2_ref[...], 0.0)            # (16, 256)

    # ---------------- stage 2: 2x2 max pool -> natural-order (8, 128) output --
    y2p = jnp.maximum(y2[:, :L2], y2[:, L2:])        # W-pool
    o_ref[...] = jnp.maximum(y2p[:8], y2p[8:])       # H-pool; one unmasked vreg store


def _encoder_pallas(lhs1, kp):
    vmem = pltpu.MemorySpace.VMEM
    return pl.pallas_call(
        _encoder_kernel,
        out_shape=jax.ShapeDtypeStruct((B * H2, W2 * C2), jnp.float32),
        in_specs=[pl.BlockSpec(memory_space=vmem)] * 7,
        out_specs=pl.BlockSpec(memory_space=vmem),
        scratch_shapes=[
            pltpu.VMEM((B * H1, K2), jnp.float32),   # stage-2 LHS staging (16, 384)
        ],
    )(lhs1, kp["w1"], kp["s1"], kp["b1"], kp["w2"], kp["s2"], kp["b2"])


# ----------------------------- parameter handling -----------------------------

def init_params(key):
    """Deterministic synthetic parameters (shapes from Encoder.__init__)."""
    ks = jax.random.split(key, 12)
    eps = 1e-5

    def make_stage(k0, k1, k2, k3, k4, k5, cin, cout):
        w = 0.1 * jax.random.normal(k0, (3, 3, cin, cout), jnp.float32)   # HWIO
        conv_b = 0.1 * jax.random.normal(k1, (cout,), jnp.float32)
        gamma = 1.0 + 0.1 * jax.random.normal(k2, (cout,), jnp.float32)
        beta = 0.1 * jax.random.normal(k3, (cout,), jnp.float32)
        run_mean = 0.1 * jax.random.normal(k4, (cout,), jnp.float32)
        run_var = 0.5 + jax.random.uniform(k5, (cout,), jnp.float32)
        # Fold conv bias + BatchNorm (eval mode / running stats) into scale+bias.
        scale = gamma / jnp.sqrt(run_var + eps)
        bias = beta + scale * (conv_b - run_mean)
        return dict(w=w, scale=scale, bias=bias)

    s1 = make_stage(*ks[0:6], cin=CIN, cout=C1)
    s2 = make_stage(*ks[6:12], cin=C1, cout=C2)
    return dict(stage1=s1, stage2=s2)


def _merged_toeplitz(w_hwio, width, cin, cout):
    """HWIO (3,3,cin,cout) -> (3*width*cin, width*cout) merged block-Toeplitz.

    * The 3 kh taps are stacked along K, so each conv stage is ONE matmul.
    * SAME zero-padding along W is folded in (out-of-range taps stay zero rows).
    * Output columns are reordered even-w-first / odd-w-last so the 2x2 W-pool
      becomes max(y[:, :half], y[:, half:]) with lane-dense natural pooled order.
    """
    w_np = np.asarray(w_hwio, np.float32)
    half = (width // 2) * cout
    t = np.zeros((3 * width * cin, width * cout), np.float32)
    for dh in range(3):
        for dw in range(3):
            for wo in range(width):
                wi = wo + dw - 1
                if 0 <= wi < width:
                    row0 = dh * width * cin + wi * cin
                    col0 = (half if wo % 2 else 0) + (wo // 2) * cout
                    t[row0:row0 + cin, col0:col0 + cout] = w_np[dh, dw]
    return jnp.asarray(t, jnp.bfloat16)


def prepare_kernel_params(params):
    """Kernel-ready params: merged bf16 Toeplitz weights + lane-tiled BN scale/bias.

    The channel index cycles every `cout` lanes in both the even-w and odd-w
    halves, so a plain tile matches the reordered column layout."""
    p1, p2 = params["stage1"], params["stage2"]
    s1 = np.tile(np.asarray(p1["scale"], np.float32), W).reshape(1, N1)
    b1 = np.tile(np.asarray(p1["bias"], np.float32), W).reshape(1, N1)
    s2 = np.tile(np.asarray(p2["scale"], np.float32), W1).reshape(1, N2)
    b2 = np.tile(np.asarray(p2["bias"], np.float32), W1).reshape(1, N2)
    return dict(
        w1=_merged_toeplitz(p1["w"], W, CIN, C1),
        s1=jnp.asarray(s1), b1=jnp.asarray(b1),
        w2=_merged_toeplitz(p2["w"], W1, C1, C2),
        s2=jnp.asarray(s2), b2=jnp.asarray(b2),
    )


# --------------------------------- forward ------------------------------------

@jax.jit
def encoder_forward(x_nchw, kp):
    # NCHW -> NHWC, pad H by 1 (SAME), lay the 3-row H window out along lanes and
    # permute rows so both in-kernel 2x2 max-pools are plain half-split maxima.
    # This is pure layout plumbing (pad / concat / gather, no arithmetic) on ~2 KB.
    x = jnp.transpose(x_nchw, (0, 2, 3, 1)).astype(jnp.float32)       # (B,H,W,CIN)
    xp = jnp.pad(x, ((0, 0), (1, 1), (0, 0), (0, 0)))                 # (B,H+2,W,CIN)
    win = jnp.concatenate(
        [xp[:, dh:dh + H].reshape(B, H, W * CIN) for dh in range(3)], axis=-1)
    lhs1 = win.reshape(B * H, K1)[_ROW_PERM1].astype(jnp.bfloat16)    # (32, 96)

    out = _encoder_pallas(lhs1, kp)                                   # (8, 128)
    out = out.reshape(B, H2, W2, C2)                                  # natural order
    # TODO(synk): nn.Dropout(0.5) is identity in eval mode; training-mode RNG
    # masking and BatchNorm batch statistics are not reproduced.
    return jnp.transpose(out, (0, 3, 1, 2))                           # NHWC -> NCHW


def _reference_forward(x_nchw, params):
    """Pure-JAX (XLA) reference for correctness checking."""
    x = jnp.transpose(x_nchw, (0, 2, 3, 1)).astype(jnp.float32)

    def stage(x, p):
        y = lax.conv_general_dilated(
            x, p["w"], window_strides=(1, 1), padding="SAME",
            dimension_numbers=("NHWC", "HWIO", "NHWC"),
            precision=lax.Precision.HIGHEST)
        y = jnp.maximum(y * p["scale"] + p["bias"], 0.0)
        Bb, Hh, Ww, Cc = y.shape
        return y.reshape(Bb, Hh // 2, 2, Ww // 2, 2, Cc).max(axis=(2, 4))

    x = stage(x, params["stage1"])
    x = stage(x, params["stage2"])
    return jnp.transpose(x, (0, 3, 1, 2))


if __name__ == "__main__":
    key = jax.random.PRNGKey(0)
    kx, kparam = jax.random.split(key)

    # Input matching nn.Conv2d(2, 16, ...): NCHW = (batch=2, channels=2, 16, 16)
    x = jax.random.normal(kx, (B, CIN, H, W), jnp.float32)
    params = init_params(kparam)
    kparams = prepare_kernel_params(params)

    out = jax.block_until_ready(encoder_forward(x, kparams))
    assert out.shape == (B, C2, H2, W2), out.shape

    ref = jax.block_until_ready(_reference_forward(x, params))
    np.testing.assert_allclose(np.asarray(out), np.asarray(ref),
                               rtol=2e-2, atol=2e-2)
    print("KERNEL_OK")
</pallas_src>

<mosaic_0001>
module attributes {stable_mosaic.version = 11 : i64} {
  func.func @_encoder_kernel(%arg0: memref<32x96xbf16, #tpu.memory_space<vmem>>, %arg1: memref<96x256xbf16, #tpu.memory_space<vmem>>, %arg2: memref<1x256xf32, #tpu.memory_space<vmem>>, %arg3: memref<1x256xf32, #tpu.memory_space<vmem>>, %arg4: memref<384x256xbf16, #tpu.memory_space<vmem>>, %arg5: memref<1x256xf32, #tpu.memory_space<vmem>>, %arg6: memref<1x256xf32, #tpu.memory_space<vmem>>, %arg7: memref<8x128xf32, #tpu.memory_space<vmem>>, %arg8: memref<16x384xf32, #tpu.memory_space<vmem>>) attributes {dimension_semantics = [], scalar_prefetch = 0 : i64, scratch_operands = 1 : i64, tpu.core_type = #tpu.core_type<tc>} {
    %c0 = arith.constant 0 : index
    %c0_0 = arith.constant 0 : index
    %0 = vector.load %arg0[%c0, %c0_0] : memref<32x96xbf16, #tpu.memory_space<vmem>>, vector<32x96xbf16>
    %c0_1 = arith.constant 0 : index
    %c0_2 = arith.constant 0 : index
    %1 = vector.load %arg1[%c0_1, %c0_2] : memref<96x256xbf16, #tpu.memory_space<vmem>>, vector<96x256xbf16>
    %cst = arith.constant dense<0.000000e+00> : vector<32x256xf32>
    %2 = tpu.matmul %0, %1, %cst {dimension_numbers = #tpu.dot_dimension_numbers<[1], [0], [0], [1], [0, 0, 1, 1], [], []>} : vector<32x96xbf16>, vector<96x256xbf16>, vector<32x256xf32> -> vector<32x256xf32>
    %c0_3 = arith.constant 0 : index
    %c0_4 = arith.constant 0 : index
    %3 = vector.load %arg2[%c0_3, %c0_4] : memref<1x256xf32, #tpu.memory_space<vmem>>, vector<1x256xf32>
    %4 = vector.broadcast %3 : vector<1x256xf32> to vector<32x256xf32>
    %5 = arith.mulf %2, %4 : vector<32x256xf32>
    %c0_5 = arith.constant 0 : index
    %c0_6 = arith.constant 0 : index
    %6 = vector.load %arg3[%c0_5, %c0_6] : memref<1x256xf32, #tpu.memory_space<vmem>>, vector<1x256xf32>
    %7 = vector.broadcast %6 : vector<1x256xf32> to vector<32x256xf32>
    %8 = arith.addf %5, %7 : vector<32x256xf32>
    %cst_7 = arith.constant 0.000000e+00 : f32
    %9 = vector.broadcast %cst_7 : f32 to vector<32x256xf32>
    %10 = arith.maximumf %8, %9 : vector<32x256xf32>
    %11 = vector.extract_strided_slice %10 {offsets = [0, 0], sizes = [32, 128], strides = [1, 1]} : vector<32x256xf32> to vector<32x128xf32>
    %12 = vector.extract_strided_slice %10 {offsets = [0, 128], sizes = [32, 128], strides = [1, 1]} : vector<32x256xf32> to vector<32x128xf32>
    %13 = arith.maximumf %11, %12 : vector<32x128xf32>
    %14 = vector.extract_strided_slice %13 {offsets = [0, 0], sizes = [16, 128], strides = [1, 1]} : vector<32x128xf32> to vector<16x128xf32>
    %15 = vector.extract_strided_slice %13 {offsets = [16, 0], sizes = [16, 128], strides = [1, 1]} : vector<32x128xf32> to vector<16x128xf32>
    %16 = arith.maximumf %14, %15 : vector<16x128xf32>
    %17 = vector.extract_strided_slice %16 {offsets = [0, 0], sizes = [8, 128], strides = [1, 1]} : vector<16x128xf32> to vector<8x128xf32>
    %18 = vector.extract_strided_slice %16 {offsets = [8, 0], sizes = [8, 128], strides = [1, 1]} : vector<16x128xf32> to vector<8x128xf32>
    %cst_8 = arith.constant 0.000000e+00 : f32
    %19 = vector.broadcast %cst_8 : f32 to vector<1x128xf32>
    %c0_9 = arith.constant 0 : index
    %c128 = arith.constant 128 : index
    %20 = vector.load %arg8[%c0_9, %c128] : memref<16x384xf32, #tpu.memory_space<vmem>>, vector<8x128xf32>
    tpu.vector_store %arg8[%c0_9, %c128], %17 {strides = array<i32>} : memref<16x384xf32, #tpu.memory_space<vmem>>, vector<8x128xf32>,
    %c0_10 = arith.constant 0 : index
    %c256 = arith.constant 256 : index
    %21 = vector.load %arg8[%c0_10, %c256] : memref<16x384xf32, #tpu.memory_space<vmem>>, vector<8x128xf32>
    tpu.vector_store %arg8[%c0_10, %c256], %18 {strides = array<i32>} : memref<16x384xf32, #tpu.memory_space<vmem>>, vector<8x128xf32>,
    %c8 = arith.constant 8 : index
    %c0_11 = arith.constant 0 : index
    %22 = vector.load %arg8[%c8, %c0_11] : memref<16x384xf32, #tpu.memory_space<vmem>>, vector<8x128xf32>
    tpu.vector_store %arg8[%c8, %c0_11], %17 {strides = array<i32>} : memref<16x384xf32, #tpu.memory_space<vmem>>, vector<8x128xf32>,
    %c8_12 = arith.constant 8 : index
    %c128_13 = arith.constant 128 : index
    %23 = vector.load %arg8[%c8_12, %c128_13] : memref<16x384xf32, #tpu.memory_space<vmem>>, vector<8x128xf32>
    tpu.vector_store %arg8[%c8_12, %c128_13], %18 {strides = array<i32>} : memref<16x384xf32, #tpu.memory_space<vmem>>, vector<8x128xf32>,
    %c0_14 = arith.constant 0 : index
    %c0_15 = arith.constant 0 : index
    %24 = vector.load %arg8[%c0_14, %c0_15] : memref<16x384xf32, #tpu.memory_space<vmem>>, vector<1x128xf32>
    tpu.vector_store %arg8[%c0_14, %c0_15], %19 {strides = array<i32>} : memref<16x384xf32, #tpu.memory_space<vmem>>, vector<1x128xf32>,
    %25 = vector.extract_strided_slice %18 {offsets = [0, 0], sizes = [3, 128], strides = [1, 1]} : vector<8x128xf32> to vector<3x128xf32>
    %c1 = arith.constant 1 : index
    %c0_16 = arith.constant 0 : index
    %26 = vector.load %arg8[%c1, %c0_16] : memref<16x384xf32, #tpu.memory_space<vmem>>, vector<3x128xf32>
    tpu.vector_store %arg8[%c1, %c0_16], %25 {strides = array<i32>} : memref<16x384xf32, #tpu.memory_space<vmem>>, vector<3x128xf32>,
    %c4 = arith.constant 4 : index
    %c0_17 = arith.constant 0 : index
    %27 = vector.load %arg8[%c4, %c0_17] : memref<16x384xf32, #tpu.memory_space<vmem>>, vector<1x128xf32>
    tpu.vector_store %arg8[%c4, %c0_17], %19 {strides = array<i32>} : memref<16x384xf32, #tpu.memory_space<vmem>>, vector<1x128xf32>,
    %28 = vector.extract_strided_slice %18 {offsets = [4, 0], sizes = [3, 128], strides = [1, 1]} : vector<8x128xf32> to vector<3x128xf32>
    %c5 = arith.constant 5 : index
    %c0_18 = arith.constant 0 : index
    %29 = vector.load %arg8[%c5, %c0_18] : memref<16x384xf32, #tpu.memory_space<vmem>>, vector<3x128xf32>
    tpu.vector_store %arg8[%c5, %c0_18], %28 {strides = array<i32>} : memref<16x384xf32, #tpu.memory_space<vmem>>, vector<3x128xf32>,
    %30 = vector.extract_strided_slice %17 {offsets = [1, 0], sizes = [3, 128], strides = [1, 1]} : vector<8x128xf32> to vector<3x128xf32>
    %c8_19 = arith.constant 8 : index
    %c256_20 = arith.constant 256 : index
    %31 = vector.load %arg8[%c8_19, %c256_20] : memref<16x384xf32, #tpu.memory_space<vmem>>, vector<3x128xf32>
    tpu.vector_store %arg8[%c8_19, %c256_20], %30 {strides = array<i32>} : memref<16x384xf32, #tpu.memory_space<vmem>>, vector<3x128xf32>,
    %c11 = arith.constant 11 : index
    %c256_21 = arith.constant 256 : index
    %32 = vector.load %arg8[%c11, %c256_21] : memref<16x384xf32, #tpu.memory_space<vmem>>, vector<1x128xf32>
    tpu.vector_store %arg8[%c11, %c256_21], %19 {strides = array<i32>} : memref<16x384xf32, #tpu.memory_space<vmem>>, vector<1x128xf32>,
    %33 = vector.extract_strided_slice %17 {offsets = [5, 0], sizes = [3, 128], strides = [1, 1]} : vector<8x128xf32> to vector<3x128xf32>
    %c12 = arith.constant 12 : index
    %c256_22 = arith.constant 256 : index
    %34 = vector.load %arg8[%c12, %c256_22] : memref<16x384xf32, #tpu.memory_space<vmem>>, vector<3x128xf32>
    tpu.vector_store %arg8[%c12, %c256_22], %33 {strides = array<i32>} : memref<16x384xf32, #tpu.memory_space<vmem>>, vector<3x128xf32>,
    %c15 = arith.constant 15 : index
    %c256_23 = arith.constant 256 : index
    %35 = vector.load %arg8[%c15, %c256_23] : memref<16x384xf32, #tpu.memory_space<vmem>>, vector<1x128xf32>
    tpu.vector_store %arg8[%c15, %c256_23], %19 {strides = array<i32>} : memref<16x384xf32, #tpu.memory_space<vmem>>, vector<1x128xf32>,
    %c0_24 = arith.constant 0 : index
    %c0_25 = arith.constant 0 : index
    %36 = vector.load %arg8[%c0_24, %c0_25] : memref<16x384xf32, #tpu.memory_space<vmem>>, vector<16x384xf32>
    %37 = arith.truncf %36 : vector<16x384xf32> to vector<16x384xbf16>
    %c0_26 = arith.constant 0 : index
    %c0_27 = arith.constant 0 : index
    %38 = vector.load %arg4[%c0_26, %c0_27] : memref<384x256xbf16, #tpu.memory_space<vmem>>, vector<384x256xbf16>
    %cst_28 = arith.constant dense<0.000000e+00> : vector<16x256xf32>
    %39 = tpu.matmul %37, %38, %cst_28 {dimension_numbers = #tpu.dot_dimension_numbers<[1], [0], [0], [1], [0, 0, 1, 1], [], []>} : vector<16x384xbf16>, vector<384x256xbf16>, vector<16x256xf32> -> vector<16x256xf32>
    %c0_29 = arith.constant 0 : index
    %c0_30 = arith.constant 0 : index
    %40 = vector.load %arg5[%c0_29, %c0_30] : memref<1x256xf32, #tpu.memory_space<vmem>>, vector<1x256xf32>
    %41 = vector.broadcast %40 : vector<1x256xf32> to vector<16x256xf32>
    %42 = arith.mulf %39, %41 : vector<16x256xf32>
    %c0_31 = arith.constant 0 : index
    %c0_32 = arith.constant 0 : index
    %43 = vector.load %arg6[%c0_31, %c0_32] : memref<1x256xf32, #tpu.memory_space<vmem>>, vector<1x256xf32>
    %44 = vector.broadcast %43 : vector<1x256xf32> to vector<16x256xf32>
    %45 = arith.addf %42, %44 : vector<16x256xf32>
    %cst_33 = arith.constant 0.000000e+00 : f32
    %46 = vector.broadcast %cst_33 : f32 to vector<16x256xf32>
    %47 = arith.maximumf %45, %46 : vector<16x256xf32>
    %48 = vector.extract_strided_slice %47 {offsets = [0, 0], sizes = [16, 128], strides = [1, 1]} : vector<16x256xf32> to vector<16x128xf32>
    %49 = vector.extract_strided_slice %47 {offsets = [0, 128], sizes = [16, 128], strides = [1, 1]} : vector<16x256xf32> to vector<16x128xf32>
    %50 = arith.maximumf %48, %49 : vector<16x128xf32>
    %51 = vector.extract_strided_slice %50 {offsets = [0, 0], sizes = [8, 128], strides = [1, 1]} : vector<16x128xf32> to vector<8x128xf32>
    %52 = vector.extract_strided_slice %50 {offsets = [8, 0], sizes = [8, 128], strides = [1, 1]} : vector<16x128xf32> to vector<8x128xf32>
    %53 = arith.maximumf %51, %52 : vector<8x128xf32>
    %c0_34 = arith.constant 0 : index
    %c0_35 = arith.constant 0 : index
    %54 = vector.load %arg7[%c0_34, %c0_35] : memref<8x128xf32, #tpu.memory_space<vmem>>, vector<8x128xf32>
    tpu.vector_store %arg7[%c0_34, %c0_35], %53 {strides = array<i32>} : memref<8x128xf32, #tpu.memory_space<vmem>>, vector<8x128xf32>,
    return
  }
}

</mosaic_0001>

<bundles_post_ra>
// kernel: encoder_forward.1
= control target key start
LH: loop header
LB: loop body
LE: loop exit
PB: predicated region body
PF: predicated region fallthrough
CT: control target
= control target key end

     0   :  { %v834_v1 = vmov 0   ;;  %vm113_vm0 = vcmask 785408   ;;  %v835_v56 = vmov 0.0   ;;  %s1089_s1 = inlined_call_operand.vmem [shape: bf16[96,256], index: 1, kind: input, shape index: {}]   ;;  %s1090_s0 = inlined_call_operand.vmem [shape: bf16[32,96], index: 0, kind: input, shape index: {}]   ;;  %s1091_s4 = inlined_call_operand.vmem [shape: bf16[384,256], index: 4, kind: input, shape index: {}]   ;;  %s1092_s2 = inlined_call_operand.vmem [shape: f32[1,256], index: 2, kind: input, shape index: {}]   ;;  %s1093_s3 = inlined_call_operand.vmem [shape: f32[1,256], index: 3, kind: input, shape index: {}]   ;;  %s1094_s5 = inlined_call_operand.vmem [shape: f32[1,256], index: 5, kind: input, shape index: {}]   ;;  %s1095_s6 = inlined_call_operand.vmem [shape: f32[1,256], index: 6, kind: input, shape index: {}]   ;;  %s1096_s7 = inlined_call_operand.vmem [shape: f32[8,128], index: 7, kind: output, shape index: {}]  }
   0x1   :  { %v742_v0 = vld [vmem:[%s1089_s1 + $0x4] ss:$8 sps:$4 sm:$0xff]   ;;  %152 = vmatprep.mubr.bf16.mxu0 %v834_v1  ;;  %v744_v2 = vld [vmem:[%s1089_s1] ss:$8 sps:$4 sm:$0xff]   ;;  %v745_v3 = vld [vmem:[%s1089_s1 + $0x14] ss:$8 sps:$4 sm:$0xff]  }
   0x2   :  { %120 = vmatprep.subr.bf16.mxu0 %v742_v0  ;;  %v747_v4 = vld [vmem:[%s1089_s1 + $0x10] ss:$8 sps:$4 sm:$0xff]   ;;  %v748_v5 = vld [vmem:[%s1089_s1 + $0x24] ss:$8 sps:$4 sm:$0xff]   ;;  %v750_v6 = vld [vmem:[%s1089_s1 + $0x20] ss:$8 sps:$4 sm:$0xff]   ;;  %v175_v0 = vlaneseq }
   0x3   :  { %121 = vmatpush1.bf16.msra.mxu0 %v744_v2  ;;  %v751_v7 = vld [vmem:[%s1089_s1 + $0x34] ss:$8 sps:$4 sm:$0xff]   ;;  %v753_v8 = vld [vmem:[%s1089_s1 + $0x30] ss:$8 sps:$4 sm:$0xff]   ;;  %v762_v9 = vld [vmem:[%s1091_s4 + $0x4] ss:$8 sps:$4 sm:$0xff]  }
   0x4   :  { %122 = vmatprep.subr.bf16.mxu0 %v745_v3  ;;  %v764_v10 = vld [vmem:[%s1091_s4] ss:$8 sps:$4 sm:$0xff]   ;;  %v754_v11 = vld [vmem:[%s1089_s1 + $0x44] ss:$8 sps:$4 sm:$0xff]   ;;  %542 = vmatprep.subr.bf16.mxu1 %v762_v9  ;;  %v765_v12 = vld [vmem:[%s1091_s4 + $0x14] ss:$8 sps:$4 sm:$0xff]  }
   0x5   :  { %543 = vmatpush1.bf16.msra.mxu1 %v764_v10  ;;  %v767_v13 = vld [vmem:[%s1091_s4 + $0x10] ss:$8 sps:$4 sm:$0xff]   ;;  %v768_v14 = vld [vmem:[%s1091_s4 + $0x24] ss:$8 sps:$4 sm:$0xff]   ;;  %v756_v15 = vld [vmem:[%s1089_s1 + $0x40] ss:$8 sps:$4 sm:$0xff]  }
   0x6   :  { %544 = vmatprep.subr.bf16.mxu1 %v765_v12  ;;  %v757_v16 = vld [vmem:[%s1089_s1 + $0x54] ss:$8 sps:$4 sm:$0xff]   ;;  %v770_v17 = vld [vmem:[%s1091_s4 + $0x20] ss:$8 sps:$4 sm:$0xff]   ;;  %v759_v19 = vld [vmem:[%s1089_s1 + $0x50] ss:$8 sps:$4 sm:$0xff]  }
   0x7   :  { %123 = vmatpush1.bf16.msra.mxu0 %v747_v4  ;;  %v771_v18 = vld [vmem:[%s1091_s4 + $0x34] ss:$8 sps:$4 sm:$0xff]   ;;  %v760_v20 = vld [vmem:[%s1090_s0] sm:$0xff]   ;;  %v773_v21 = vld [vmem:[%s1091_s4 + $0x30] ss:$8 sps:$4 sm:$0xff]  }
   0x8   :  { %124 = vmatprep.subr.bf16.mxu0 %v748_v5  ;;  %v774_v22 = vld [vmem:[%s1091_s4 + $0x44] ss:$8 sps:$4 sm:$0xff]   ;;  %v776_v23 = vld [vmem:[%s1091_s4 + $0x40] ss:$8 sps:$4 sm:$0xff]   ;;  %v777_v24 = vld [vmem:[%s1091_s4 + $0x54] ss:$8 sps:$4 sm:$0xff]  }
   0x9   :  { %545 = vmatpush1.bf16.msra.mxu1 %v767_v13  ;;  %v779_v25 = vld [vmem:[%s1091_s4 + $0x50] ss:$8 sps:$4 sm:$0xff]   ;;  %v761_v26 = vld [vmem:[%s1090_s0 + $0x8] sm:$0xff]   ;;  %v783_v29 = vld [vmem:[%s1091_s4 + $0x74] ss:$8 sps:$4 sm:$0xff]  }
   0xa   :  { %546 = vmatprep.subr.bf16.mxu1 %v768_v14  ;;  %v780_v27 = vld [vmem:[%s1091_s4 + $0x64] ss:$8 sps:$4 sm:$0xff]   ;;  %v782_v28 = vld [vmem:[%s1091_s4 + $0x60] ss:$8 sps:$4 sm:$0xff]   ;;  %v785_v30 = vld [vmem:[%s1091_s4 + $0x70] ss:$8 sps:$4 sm:$0xff]  }
   0xb   :  { %125 = vmatpush1.bf16.msra.mxu0 %v750_v6  ;;  %v788_v31 = vld [vmem:[%s1091_s4 + $0x104] ss:$8 sps:$4 sm:$0xff]   ;;  %v786_v32 = vld [vmem:[%s1091_s4 + $0x100] ss:$8 sps:$4 sm:$0xff]   ;;  %v794_v35 = vld [vmem:[%s1091_s4 + $0x114] ss:$8 sps:$4 sm:$0xff]  }
   0xc   :  { %126 = vmatprep.subr.bf16.mxu0 %v751_v7  ;;  %v789_v33 = vld [vmem:[%s1091_s4 + $0x84] ss:$8 sps:$4 sm:$0xff]   ;;  %v791_v34 = vld [vmem:[%s1091_s4 + $0x80] ss:$8 sps:$4 sm:$0xff]   ;;  %v792_v36 = vld [vmem:[%s1091_s4 + $0x110] ss:$8 sps:$4 sm:$0xff]  }
   0xd   :  { %547 = vmatpush1.bf16.msra.mxu1 %v770_v17  ;;  %v795_v37 = vld [vmem:[%s1091_s4 + $0x94] ss:$8 sps:$4 sm:$0xff]   ;;  %v797_v38 = vld [vmem:[%s1091_s4 + $0x90] ss:$8 sps:$4 sm:$0xff]   ;;  %v800_v39 = vld [vmem:[%s1091_s4 + $0x124] ss:$8 sps:$4 sm:$0xff]  }
   0xe   :  { %548 = vmatprep.subr.bf16.mxu1 %v771_v18  ;;  %v798_v40 = vld [vmem:[%s1091_s4 + $0x120] ss:$8 sps:$4 sm:$0xff]   ;;  %v801_v41 = vld [vmem:[%s1091_s4 + $0xa4] ss:$8 sps:$4 sm:$0xff]   ;;  %v806_v43 = vld [vmem:[%s1091_s4 + $0x134] ss:$8 sps:$4 sm:$0xff]  }
   0xf   :  { %127 = vmatpush1.bf16.msra.mxu0 %v753_v8  ;;  %v803_v42 = vld [vmem:[%s1091_s4 + $0xa0] ss:$8 sps:$4 sm:$0xff]   ;;  %v804_v44 = vld [vmem:[%s1091_s4 + $0x130] ss:$8 sps:$4 sm:$0xff]   ;;  %v807_v45 = vld [vmem:[%s1091_s4 + $0xb4] ss:$8 sps:$4 sm:$0xff]  }
  0x10   :  { %128 = vmatprep.subr.bf16.mxu0 %v754_v11  ;;  %v809_v46 = vld [vmem:[%s1091_s4 + $0xb0] ss:$8 sps:$4 sm:$0xff]   ;;  %v812_v47 = vld [vmem:[%s1091_s4 + $0x144] ss:$8 sps:$4 sm:$0xff]   ;;  %v810_v48 = vld [vmem:[%s1091_s4 + $0x140] ss:$8 sps:$4 sm:$0xff]  }
  0x11   :  { %549 = vmatpush1.bf16.msra.mxu1 %v773_v21  ;;  %v813_v49 = vld [vmem:[%s1091_s4 + $0xc4] ss:$8 sps:$4 sm:$0xff]   ;;  %v815_v50 = vld [vmem:[%s1091_s4 + $0xc0] ss:$8 sps:$4 sm:$0xff]   ;;  %v818_v51 = vld [vmem:[%s1091_s4 + $0x154] ss:$8 sps:$4 sm:$0xff]  }
  0x12   :  { %550 = vmatprep.subr.bf16.mxu1 %v774_v22  ;;  %v816_v52 = vld [vmem:[%s1091_s4 + $0x150] ss:$8 sps:$4 sm:$0xff]   ;;  %v819_v53 = vld [vmem:[%s1091_s4 + $0xd4] ss:$8 sps:$4 sm:$0xff]   ;;  %v824_v55 = vld [vmem:[%s1091_s4 + $0x164] ss:$8 sps:$4 sm:$0xff]  }
  0x13   :  { %129 = vmatpush1.bf16.msra.mxu0 %v756_v15  ;;  %v821_v54 = vld [vmem:[%s1091_s4 + $0xd0] ss:$8 sps:$4 sm:$0xff]   ;;  %242 = vst [vmem:[#allocation2 + $0x2b] sm:$0x1] %v835_v56  ;;  %244 = vst [vmem:[#allocation2 + $0x2f] sm:$0x1] %v835_v56 }
  0x14   :  { %130 = vmatprep.subr.bf16.mxu0 %v757_v16  ;;  %231 = vst [vmem:[#allocation2] sm:$0x1] %v835_v56  ;;  %236 = vst [vmem:[#allocation2 + $0x4] sm:$0x1] %v835_v56  ;;  %v822_v57 = vld [vmem:[%s1091_s4 + $0x160] ss:$8 sps:$4 sm:$0xff]  }
  0x15   :  { %551 = vmatpush1.bf16.msra.mxu1 %v776_v23  ;;  %v825_v58 = vld [vmem:[%s1091_s4 + $0xe4] ss:$8 sps:$4 sm:$0xff]   ;;  %v827_v59 = vld [vmem:[%s1091_s4 + $0xe0] ss:$8 sps:$4 sm:$0xff]   ;;  %v828_v60 = vld [vmem:[%s1091_s4 + $0x170] ss:$8 sps:$4 sm:$0xff]  }
  0x16   :  { %552 = vmatprep.subr.bf16.mxu1 %v777_v24  ;;  %v830_v61 = vld [vmem:[%s1091_s4 + $0x174] ss:$8 sps:$4 sm:$0xff]   ;;  %v833_v63 = vld [vmem:[%s1091_s4 + $0xf0] ss:$8 sps:$4 sm:$0xff]   ;;  %v173_v3 = vld [vmem:[%s1092_s2] sm:$0x3] }
  0x17   :  { %131 = vmatpush1.bf16.msra.mxu0 %v759_v19  ;;  %v831_v62 = vld [vmem:[%s1091_s4 + $0xf4] ss:$8 sps:$4 sm:$0xff]   ;;  %v193_v5 = vld [vmem:[%s1093_s3] sm:$0x3] }
  0x18   :  { %585 = vmatprep.subr.bf16.mxu0 %v788_v31 }
  0x19   :  { %553 = vmatpush1.bf16.msra.mxu1 %v779_v25 }
  0x1a   :  { %686 = vmatmul.mubr.msk.bf16.vlgmr.msra.gmra.mrb[0].mxu0 %vm113_vm0, %v760_v20  ;;  %554 = vmatprep.subr.bf16.mxu1 %v780_v27 }
  0x1b   :  { %162 = vmatprep.mubr.bf16.mxu0 %v834_v1  ;;  %586 = vmatpush1.bf16.msra.mxu0 %v786_v32 }
  0x1c   :  { %587 = vmatprep.subr.bf16.mxu0 %v794_v35 }
  0x1d   :  { %555 = vmatpush1.bf16.msra.mxu1 %v782_v28 }
  0x1e   :  { %556 = vmatprep.subr.bf16.mxu1 %v783_v29 }
  0x1f   :  { %588 = vmatpush1.bf16.msra.mxu0 %v792_v36 }
  0x20   :  { %589 = vmatprep.subr.bf16.mxu0 %v800_v39 }
  0x21   :  { %557 = vmatpush1.bf16.msra.mxu1 %v785_v30 }
  0x22   :  { %687 = vmatmul.mubr.msk.bf16.gmra.mrb[4].mxu0 %vm113_vm0, %v761_v26  ;;  %558 = vmatprep.subr.bf16.mxu1 %v789_v33 }
  0x23   :  { %617 = vmatprep.mubr.bf16.mxu0 %v834_v1  ;;  %590 = vmatpush1.bf16.msra.mxu0 %v798_v40  ;;  %v176_v1 = vshrl.u32 %v175_v0, 7 }
  0x24   :  { %591 = vmatprep.subr.bf16.mxu0 %v806_v43 }
  0x25   :  { %559 = vmatpush1.bf16.msra.mxu1 %v791_v34  ;;  %v1062_v2 = vsub.s32 0, %v176_v1  ;;  %v1067_v4 = vsub.s32 1, %v176_v1 }
  0x26   :  { %560 = vmatprep.subr.bf16.mxu1 %v795_v37 }
  0x27   :  { %592 = vmatpush1.bf16.msra.mxu0 %v804_v44  ;;  %v178_v6 = vrot.slane %v173_v3, %v1062_v2  ;;  %v182_v7 = vrot.slane %v173_v3, %v1067_v4  ;;  %v198_v8 = vrot.slane %v193_v5, %v1062_v2  ;;  %v202_v10 = vrot.slane %v193_v5, %v1067_v4 }
  0x28   :  { %593 = vmatprep.subr.bf16.mxu0 %v812_v47 }
  0x29   :  { %561 = vmatpush1.bf16.msra.mxu1 %v797_v38 }
  0x2a   :  { %562 = vmatprep.subr.bf16.mxu1 %v801_v41 }
  0x2b   :  { %594 = vmatpush1.bf16.msra.mxu0 %v810_v48 }
  0x2c   :  { %595 = vmatprep.subr.bf16.mxu0 %v818_v51 }
  0x2d   :  { %563 = vmatpush1.bf16.msra.mxu1 %v803_v42 }
  0x2e   :  { %564 = vmatprep.subr.bf16.mxu1 %v807_v45 }
  0x2f   :  { %596 = vmatpush1.bf16.msra.mxu0 %v816_v52 }
  0x30   :  { %597 = vmatprep.subr.bf16.mxu0 %v824_v55  ;;  %v628_v55 = vld [vmem:[%s1094_s5] sm:$0x3] }
  0x31   :  { %565 = vmatpush1.bf16.msra.mxu1 %v809_v46 }
  0x32   :  { %566 = vmatprep.subr.bf16.mxu1 %v813_v49 }
  0x33   :  { %598 = vmatpush1.bf16.msra.mxu0 %v822_v57  ;;  %v644_v57 = vld [vmem:[%s1095_s6] sm:$0x3] }
  0x34   :  { %599 = vmatprep.subr.bf16.mxu0 %v830_v61  ;;  %v649_v0 = vrot.slane %v644_v57, %v1062_v2 }
  0x35   :  { %567 = vmatpush1.bf16.msra.mxu1 %v815_v50 }
  0x36   :  { %568 = vmatprep.subr.bf16.mxu1 %v819_v53 }
  0x37   :  { %600 = vmatpush1.bf16.msra.mxu0 %v828_v60 }
  0x39   :  { %569 = vmatpush1.bf16.msra.mxu1 %v821_v54 }
  0x3a   :  { %570 = vmatprep.subr.bf16.mxu1 %v825_v58 }
  0x3d   :  { %571 = vmatpush1.bf16.msra.mxu1 %v827_v59  ;;  %v633_v59 = vrot.slane %v628_v55, %v1062_v2 }
  0x3e   :  { %572 = vmatprep.subr.bf16.mxu1 %v831_v62  ;;  %v637_v62 = vrot.slane %v628_v55, %v1067_v4 }
  0x41   :  { %573 = vmatpush1.bf16.msra.mxu1 %v833_v63 }
  0xed   :  { %v154_v9 = vpop.f32.mrb[0].mxu0 }
  0xee   :  { %v185_v11 = vmul.f32 %v178_v6, %v154_v9  ;;  %v156_v12 = vpop.f32.mrb[1].mxu0 }
  0xef   :  { %v186_v13 = vmul.f32 %v182_v7, %v156_v12  ;;  %v158_v14 = vpop.f32.mrb[2].mxu0 }
  0xf0   :  { %v205_v15 = vadd.f32 %v198_v8, %v185_v11  ;;  %v187_v16 = vmul.f32 %v178_v6, %v158_v14  ;;  %v160_v17 = vpop.f32.mrb[3].mxu0 }
  0xf1   :  { %v206_v18 = vadd.f32 %v202_v10, %v186_v13  ;;  %v188_v19 = vmul.f32 %v182_v7, %v160_v17 }
  0xf2   :  { %v213_v20 = vmax.f32 %v205_v15, 0.0  ;;  %v207_v21 = vadd.f32 %v198_v8, %v187_v16 }
  0xf3   :  { %v214_v22 = vmax.f32 %v206_v18, 0.0  ;;  %v208_v23 = vadd.f32 %v202_v10, %v188_v19 }
  0xf4   :  { %v215_v24 = vmax.f32 %v207_v21, 0.0 }
  0xf5   :  { %v221_v25 = vmax.f32 %v213_v20, %v214_v22  ;;  %v216_v26 = vmax.f32 %v208_v23, 0.0  ;;  %v164_v27 = vpop.f32.mrb[4].mxu0 }
  0xf6   :  { %v189_v28 = vmul.f32 %v178_v6, %v164_v27  ;;  %v166_v29 = vpop.f32.mrb[5].mxu0 }
  0xf7   :  { %v222_v30 = vmax.f32 %v215_v24, %v216_v26  ;;  %v190_v31 = vmul.f32 %v182_v7, %v166_v29  ;;  %v168_v32 = vpop.f32.mrb[6].mxu0 }
  0xf8   :  { %v209_v33 = vadd.f32 %v198_v8, %v189_v28  ;;  %v191_v34 = vmul.f32 %v178_v6, %v168_v32  ;;  %v170_v35 = vpop.f32.mrb[7].mxu0  ;;  %v653_v6 = vrot.slane %v644_v57, %v1067_v4 }
  0xf9   :  { %v210_v36 = vadd.f32 %v202_v10, %v190_v31  ;;  %v192_v37 = vmul.f32 %v182_v7, %v170_v35 }
  0xfa   :  { %v217_v38 = vmax.f32 %v209_v33, 0.0  ;;  %v211_v39 = vadd.f32 %v198_v8, %v191_v34 }
  0xfb   :  { %v218_v40 = vmax.f32 %v210_v36, 0.0  ;;  %v212_v41 = vadd.f32 %v202_v10, %v192_v37 }
  0xfc   :  { %v219_v42 = vmax.f32 %v211_v39, 0.0 }
  0xfd   :  { %v223_v43 = vmax.f32 %v217_v38, %v218_v40  ;;  %v220_v44 = vmax.f32 %v212_v41, 0.0 }
  0xff   :  { %v225_v45 = vmax.f32 %v221_v25, %v223_v43  ;;  %v224_v46 = vmax.f32 %v219_v42, %v220_v44 }
 0x101   :  { %v239_v47 = vrot.slane %v225_v45, 1  ;;  %v226_v48 = vmax.f32 %v222_v30, %v224_v46 }
 0x103   :  { %241 = vst [vmem:[#allocation2 + $0x28] sm:$0x77] %v239_v47   ;;  %v233_v49 = vrot.slane %v226_v48, 7  ;;  %v252_v50 = vpack.c.bf16 %v226_v48, %v225_v45 }
 0x105   :  { %235 = vst [vmem:[#allocation2] sm:$0xee] %v233_v49   ;;  %574 = vmatprep.mubr.bf16.mxu1 %v252_v50 }
 0x10a   :  { %v250_v51 = vld [vmem:[#allocation2 + $0x28] sm:$0xff] }
 0x10b   :  { %v253_v52 = vpack.c.bf16 %v250_v51, %v226_v48 }
 0x10c   :  { %v245_v53 = vld [vmem:[#allocation2] sm:$0xff] }
 0x10d   :  { %618 = vmatmul.mubr.bf16.vlgmr.msra.gmra.mrb[8].mxu0 %v253_v52  ;;  %v251_v54 = vpack.c.bf16 %v225_v45, %v245_v53 }
 0x10f   :  { %575 = vmatmul.mubr.bf16.vlgmr.msra.gmra.mrb[0].mxu1 %v251_v54 }
 0x1e0   :  { %v619_v56 = vpop.f32.mrb[8].mxu0 }
 0x1e1   :  { %v621_v58 = vpop.f32.mrb[9].mxu0 }
 0x1e2   :  { %v576_v60 = vpop.f32.mrb[0].mxu1  ;;  %v623_v61 = vpop.f32.mrb[10].mxu0 }
 0x1e3   :  { %v620_v63 = vadd.f32 %v619_v56, %v576_v60  ;;  %v578_v1 = vpop.f32.mrb[1].mxu1  ;;  %v625_v3 = vpop.f32.mrb[11].mxu0 }
 0x1e4   :  { %v622_v5 = vadd.f32 %v621_v58, %v578_v1  ;;  %v580_v7 = vpop.f32.mrb[2].mxu1 }
 0x1e5   :  { %v640_v8 = vmul.f32 %v633_v59, %v620_v63  ;;  %v624_v9 = vadd.f32 %v623_v61, %v580_v7  ;;  %v582_v10 = vpop.f32.mrb[3].mxu1 }
 0x1e6   :  { %v641_v11 = vmul.f32 %v637_v62, %v622_v5  ;;  %v626_v12 = vadd.f32 %v625_v3, %v582_v10 }
 0x1e7   :  { %v656_v13 = vadd.f32 %v649_v0, %v640_v8  ;;  %v642_v14 = vmul.f32 %v633_v59, %v624_v9 }
 0x1e8   :  { %v657_v15 = vadd.f32 %v653_v6, %v641_v11  ;;  %v643_v16 = vmul.f32 %v637_v62, %v626_v12 }
 0x1e9   :  { %v660_v17 = vmax.f32 %v656_v13, 0.0  ;;  %v658_v18 = vadd.f32 %v649_v0, %v642_v14 }
 0x1ea   :  { %v661_v19 = vmax.f32 %v657_v15, 0.0  ;;  %v659_v20 = vadd.f32 %v653_v6, %v643_v16 }
 0x1eb   :  { %v662_v2 = vmax.f32 %v658_v18, 0.0 }
 0x1ec   :  { %v664_v21 = vmax.f32 %v660_v17, %v661_v19  ;;  %v663_v22 = vmax.f32 %v659_v20, 0.0 }
 0x1ee   :  { %v665_v23 = vmax.f32 %v662_v2, %v663_v22 }
 0x1f0   :  { %v666_v24 = vmax.f32 %v664_v21, %v665_v23 }
 0x1f2   :  { %667 = vst [vmem:[%s1096_s7] sm:$0xff] %v666_v24 }

</bundles_post_ra>
